<compile_context>
chip_gen: v7x
topology: tpu7x:2x2x1
jax: 0.10.0
libtpu: 0.0.40
codegen_flags: <defaults>
</compile_context>

<pallas_src>
import math
import functools

import jax
import jax.numpy as jnp
from jax.experimental import pallas as pl
from jax.experimental.pallas import tpu as pltpu


def _round_up(x: int, m: int) -> int:
    return (x + m - 1) // m * m


# ----------------------------------------------------------------------------
# Kernel: full L-layer MLP on one row tile; weights for this net group are
# fully VMEM-resident (constant block index across row tiles).
#   x_ref: (TB, Fp)            activation input tile
#   w_ref: (1, L, Fp, Fp)      scaled, transposed (in, out) weights
#   b_ref: (1, L, 1, Fp)       biases
#   o_ref: (1, TB, Fp)         output tile
# ----------------------------------------------------------------------------
def mlp_kernel(x_ref, w_ref, b_ref, o_ref, *, n_layers, negative_slope):
    x = x_ref[...].astype(jnp.float32)
    for l in range(n_layers):                       # static, small L -> fully unrolled
        w = w_ref[0, l]                             # (Fp, Fp)
        b = b_ref[0, l]                             # (1, Fp)
        y = jnp.dot(x, w, preferred_element_type=jnp.float32) + b
        x = jnp.where(y >= 0.0, y, negative_slope * y)   # LeakyReLU(0.2)
    o_ref[0, :, :] = x.astype(o_ref.dtype)


# ----------------------------------------------------------------------------
# Host-side parameter prep
# ----------------------------------------------------------------------------
def _prep_params_packed(wc, bc, ws, bs, f_pad):
    """Block-diagonal packing of net_c / net_s into one weight (2F <= f_pad lanes)."""
    L, f_out, f_in = wc.shape
    scale = 1.0 / math.sqrt(f_in)                               # EqualizedWeight c
    Wc = jnp.transpose(wc, (0, 2, 1)).astype(jnp.float32) * scale   # (L, in, out)
    Ws = jnp.transpose(ws, (0, 2, 1)).astype(jnp.float32) * scale
    F = f_in
    W = jnp.zeros((1, L, f_pad, f_pad), jnp.float32)
    W = W.at[0, :, 0:F, 0:F].set(Wc)
    W = W.at[0, :, F:2 * F, F:2 * F].set(Ws)
    B = jnp.zeros((1, L, 1, f_pad), jnp.float32)
    B = B.at[0, :, 0, 0:F].set(bc.astype(jnp.float32))
    B = B.at[0, :, 0, F:2 * F].set(bs.astype(jnp.float32))
    return W, B


def _prep_params_separate(wc, bc, ws, bs, f_pad):
    """Separate net_c / net_s weight stacks (used when 2F > 128)."""
    L, f_out, f_in = wc.shape
    scale = 1.0 / math.sqrt(f_in)
    W = jnp.stack([wc, ws], axis=0).astype(jnp.float32) * scale     # (2, L, out, in)
    W = jnp.transpose(W, (0, 1, 3, 2))                              # (2, L, in, out)
    W = jnp.pad(W, ((0, 0), (0, 0), (0, f_pad - f_in), (0, f_pad - f_out)))
    B = jnp.stack([bc, bs], axis=0).astype(jnp.float32)             # (2, L, out)
    B = jnp.pad(B, ((0, 0), (0, 0), (0, f_pad - f_out))).reshape(2, L, 1, f_pad)
    return W, B


# ----------------------------------------------------------------------------
# Forward wrapper
# ----------------------------------------------------------------------------
@jax.jit
def mapping_network_cs_forward(z, wc, bc, ws, bs):
    """z: (B, N, F); wc/ws: (L, F, F) torch (out,in); bc/bs: (L, F). Returns (c, s)."""
    B, N, F = z.shape
    L = wc.shape[0]
    BN = B * N

    packed = (2 * F) <= 128
    Fp = 128 if packed else _round_up(F, 128)       # lane-dense feature dim
    G = 1 if packed else 2                          # net groups in the grid

    # Row tile: large for big BN (amortize per-step overhead), sublane-aligned otherwise.
    if BN >= 1024:
        TB = 1024
    elif BN >= 512:
        TB = 512
    elif BN >= 256:
        TB = 256
    else:
        TB = _round_up(BN, 8)
    BNp = _round_up(BN, TB)
    n_tiles = BNp // TB

    # F.normalize(z, dim=1) in plain jnp (fused by XLA into the pad/copy below).
    zf = z.astype(jnp.float32)
    norm = jnp.sqrt(jnp.sum(zf * zf, axis=1, keepdims=True))
    zn = (zf / jnp.maximum(norm, 1e-12)).reshape(BN, F)

    # Padded, lane-dense activation input.  Padding is exact: padded lanes/rows carry
    # zeros through zero weight rows/cols (padded rows only ever pick up bias values
    # and are sliced off below).
    x0 = jnp.zeros((BNp, Fp), jnp.float32)
    x0 = x0.at[:BN, 0:F].set(zn)
    if packed:
        x0 = x0.at[:BN, F:2 * F].set(zn)            # duplicate zn into the s-path lanes
        Wp, Bp = _prep_params_packed(wc, bc, ws, bs, Fp)
    else:
        Wp, Bp = _prep_params_separate(wc, bc, ws, bs, Fp)

    grid = (G, n_tiles)                             # g outer (weights fetched G times),
                                                    # row tiles inner ("parallel")
    flops = 2 * G * L * BNp * Fp * Fp
    bytes_accessed = 4 * (G * BNp * Fp            # activation reads (once per net group)
                          + G * L * Fp * Fp       # resident weights, fetched once per group
                          + G * L * Fp            # biases
                          + G * BNp * Fp)         # output writes
    cost = pl.CostEstimate(flops=flops, transcendentals=0, bytes_accessed=bytes_accessed)

    # Double-buffered block footprint + headroom, capped at the 32 MiB scoped default.
    blk_bytes = 4 * (2 * TB * Fp + 2 * L * Fp * Fp + 2 * L * Fp + 2 * TB * Fp)
    vmem_limit = int(min(max(2 * blk_bytes, 16 * 1024 * 1024), 32 * 1024 * 1024))

    out = pl.pallas_call(
        functools.partial(mlp_kernel, n_layers=L, negative_slope=0.2),
        out_shape=jax.ShapeDtypeStruct((G, BNp, Fp), jnp.float32),
        grid=grid,
        in_specs=[
            # activation row tile: constant across the net-group axis
            pl.BlockSpec((TB, Fp), lambda g, i: (i, 0)),
            # weights: whole L-layer stack for this net group, VMEM-resident across tiles
            pl.BlockSpec((1, L, Fp, Fp), lambda g, i: (g, 0, 0, 0)),
            pl.BlockSpec((1, L, 1, Fp), lambda g, i: (g, 0, 0, 0)),
        ],
        out_specs=pl.BlockSpec((1, TB, Fp), lambda g, i: (g, i, 0)),
        compiler_params=pltpu.CompilerParams(
            dimension_semantics=("parallel", "parallel"),
            vmem_limit_bytes=vmem_limit,
        ),
        cost_estimate=cost,
    )(x0, Wp, Bp)

    if packed:
        c = out[0, :BN, 0:F].reshape(B, N, F)
        s = out[0, :BN, F:2 * F].reshape(B, N, F)
    else:
        c = out[0, :BN, 0:F].reshape(B, N, F)
        s = out[1, :BN, 0:F].reshape(B, N, F)
    return c.astype(z.dtype), s.astype(z.dtype)


# ----------------------------------------------------------------------------
# Pure-JAX reference mirroring the PyTorch module
# ----------------------------------------------------------------------------
def mapping_network_cs_reference(z, wc, bc, ws, bs):
    F = z.shape[-1]
    scale = 1.0 / math.sqrt(F)
    norm = jnp.sqrt(jnp.sum(z * z, axis=1, keepdims=True))
    x0 = z / jnp.maximum(norm, 1e-12)

    def run(x, W, Bv):
        for l in range(W.shape[0]):
            y = x @ (W[l] * scale).T + Bv[l]
            x = jnp.where(y >= 0.0, y, 0.2 * y)
        return x

    return run(x0, wc, bc), run(x0, ws, bs)


if __name__ == "__main__":
    batch, n_slices, features, n_layers = 2, 4, 32, 4

    key = jax.random.PRNGKey(0)
    kz, kwc, kws, kbc, kbs = jax.random.split(key, 5)

    z = jax.random.normal(kz, (batch, n_slices, features), dtype=jnp.float32)
    # EqualizedLinear weight: torch.randn((out, in)); bias init is 0.0 but we use
    # small random biases to exercise the bias path (a valid trained-parameter state).
    wc = jax.random.normal(kwc, (n_layers, features, features), dtype=jnp.float32)
    ws = jax.random.normal(kws, (n_layers, features, features), dtype=jnp.float32)
    bc = 0.1 * jax.random.normal(kbc, (n_layers, features), dtype=jnp.float32)
    bs = 0.1 * jax.random.normal(kbs, (n_layers, features), dtype=jnp.float32)

    c, s = mapping_network_cs_forward(z, wc, bc, ws, bs)
    c, s = jax.block_until_ready((c, s))

    c_ref, s_ref = mapping_network_cs_reference(z, wc, bc, ws, bs)
    assert jnp.allclose(c, c_ref, atol=1e-4, rtol=1e-4), "c mismatch vs reference"
    assert jnp.allclose(s, s_ref, atol=1e-4, rtol=1e-4), "s mismatch vs reference"

    print("KERNEL_OK")
</pallas_src>

<mosaic_0001>
module attributes {stable_mosaic.version = 11 : i64} {
  func.func @mlp_kernel(%arg0: i32, %arg1: i32, %arg2: memref<8x128xf32, #tpu.memory_space<vmem>>, %arg3: memref<1x4x128x128xf32, #tpu.memory_space<vmem>>, %arg4: memref<1x4x1x128xf32, #tpu.memory_space<vmem>>, %arg5: memref<1x8x128xf32, #tpu.memory_space<vmem>>) attributes {dimension_semantics = [#tpu.dimension_semantics<parallel>, #tpu.dimension_semantics<parallel>], iteration_bounds = array<i64: 1, 1>, scalar_prefetch = 0 : i64, scratch_operands = 0 : i64, tpu.core_type = #tpu.core_type<tc>, window_params = [{transform_indices = @transform_0, window_bounds = array<i64: 8, 128>}, {transform_indices = @transform_1, window_bounds = array<i64: 1, 4, 128, 128>}, {transform_indices = @transform_2, window_bounds = array<i64: 1, 4, 1, 128>}, {transform_indices = @transform_3, window_bounds = array<i64: 1, 8, 128>}]} {
    %c0 = arith.constant 0 : index
    %c0_0 = arith.constant 0 : index
    %0 = vector.load %arg2[%c0, %c0_0] : memref<8x128xf32, #tpu.memory_space<vmem>>, vector<8x128xf32>
    %c0_1 = arith.constant 0 : index
    %c0_2 = arith.constant 0 : index
    %c0_3 = arith.constant 0 : index
    %c0_4 = arith.constant 0 : index
    %1 = vector.load %arg3[%c0_1, %c0_2, %c0_3, %c0_4] : memref<1x4x128x128xf32, #tpu.memory_space<vmem>>, vector<1x1x128x128xf32>
    %2 = vector.shape_cast %1 : vector<1x1x128x128xf32> to vector<128x128xf32>
    %c0_5 = arith.constant 0 : index
    %c0_6 = arith.constant 0 : index
    %c0_7 = arith.constant 0 : index
    %c0_8 = arith.constant 0 : index
    %3 = vector.load %arg4[%c0_5, %c0_6, %c0_7, %c0_8] : memref<1x4x1x128xf32, #tpu.memory_space<vmem>>, vector<1x1x1x128xf32>
    %4 = vector.shape_cast %3 : vector<1x1x1x128xf32> to vector<1x128xf32>
    %cst = arith.constant dense<0.000000e+00> : vector<8x128xf32>
    %5 = tpu.matmul %0, %2, %cst {dimension_numbers = #tpu.dot_dimension_numbers<[1], [0], [0], [1], [0, 0, 1, 1], [], []>} : vector<8x128xf32>, vector<128x128xf32>, vector<8x128xf32> -> vector<8x128xf32>
    %6 = vector.broadcast %4 : vector<1x128xf32> to vector<8x128xf32>
    %7 = arith.addf %5, %6 : vector<8x128xf32>
    %cst_9 = arith.constant 0.000000e+00 : f32
    %8 = vector.broadcast %cst_9 : f32 to vector<8x128xf32>
    %9 = arith.cmpf oge, %7, %8 : vector<8x128xf32>
    %cst_10 = arith.constant 2.000000e-01 : f32
    %10 = vector.broadcast %cst_10 : f32 to vector<8x128xf32>
    %11 = arith.mulf %10, %7 : vector<8x128xf32>
    %12 = arith.select %9, %7, %11 : vector<8x128xi1>, vector<8x128xf32>
    %c0_11 = arith.constant 0 : index
    %c1 = arith.constant 1 : index
    %c0_12 = arith.constant 0 : index
    %c0_13 = arith.constant 0 : index
    %13 = vector.load %arg3[%c0_11, %c1, %c0_12, %c0_13] : memref<1x4x128x128xf32, #tpu.memory_space<vmem>>, vector<1x1x128x128xf32>
    %14 = vector.shape_cast %13 : vector<1x1x128x128xf32> to vector<128x128xf32>
    %c0_14 = arith.constant 0 : index
    %c1_15 = arith.constant 1 : index
    %c0_16 = arith.constant 0 : index
    %c0_17 = arith.constant 0 : index
    %15 = vector.load %arg4[%c0_14, %c1_15, %c0_16, %c0_17] : memref<1x4x1x128xf32, #tpu.memory_space<vmem>>, vector<1x1x1x128xf32>
    %16 = vector.shape_cast %15 : vector<1x1x1x128xf32> to vector<1x128xf32>
    %cst_18 = arith.constant dense<0.000000e+00> : vector<8x128xf32>
    %17 = tpu.matmul %12, %14, %cst_18 {dimension_numbers = #tpu.dot_dimension_numbers<[1], [0], [0], [1], [0, 0, 1, 1], [], []>} : vector<8x128xf32>, vector<128x128xf32>, vector<8x128xf32> -> vector<8x128xf32>
    %18 = vector.broadcast %16 : vector<1x128xf32> to vector<8x128xf32>
    %19 = arith.addf %17, %18 : vector<8x128xf32>
    %cst_19 = arith.constant 0.000000e+00 : f32
    %20 = vector.broadcast %cst_19 : f32 to vector<8x128xf32>
    %21 = arith.cmpf oge, %19, %20 : vector<8x128xf32>
    %cst_20 = arith.constant 2.000000e-01 : f32
    %22 = vector.broadcast %cst_20 : f32 to vector<8x128xf32>
    %23 = arith.mulf %22, %19 : vector<8x128xf32>
    %24 = arith.select %21, %19, %23 : vector<8x128xi1>, vector<8x128xf32>
    %c0_21 = arith.constant 0 : index
    %c2 = arith.constant 2 : index
    %c0_22 = arith.constant 0 : index
    %c0_23 = arith.constant 0 : index
    %25 = vector.load %arg3[%c0_21, %c2, %c0_22, %c0_23] : memref<1x4x128x128xf32, #tpu.memory_space<vmem>>, vector<1x1x128x128xf32>
    %26 = vector.shape_cast %25 : vector<1x1x128x128xf32> to vector<128x128xf32>
    %c0_24 = arith.constant 0 : index
    %c2_25 = arith.constant 2 : index
    %c0_26 = arith.constant 0 : index
    %c0_27 = arith.constant 0 : index
    %27 = vector.load %arg4[%c0_24, %c2_25, %c0_26, %c0_27] : memref<1x4x1x128xf32, #tpu.memory_space<vmem>>, vector<1x1x1x128xf32>
    %28 = vector.shape_cast %27 : vector<1x1x1x128xf32> to vector<1x128xf32>
    %cst_28 = arith.constant dense<0.000000e+00> : vector<8x128xf32>
    %29 = tpu.matmul %24, %26, %cst_28 {dimension_numbers = #tpu.dot_dimension_numbers<[1], [0], [0], [1], [0, 0, 1, 1], [], []>} : vector<8x128xf32>, vector<128x128xf32>, vector<8x128xf32> -> vector<8x128xf32>
    %30 = vector.broadcast %28 : vector<1x128xf32> to vector<8x128xf32>
    %31 = arith.addf %29, %30 : vector<8x128xf32>
    %cst_29 = arith.constant 0.000000e+00 : f32
    %32 = vector.broadcast %cst_29 : f32 to vector<8x128xf32>
    %33 = arith.cmpf oge, %31, %32 : vector<8x128xf32>
    %cst_30 = arith.constant 2.000000e-01 : f32
    %34 = vector.broadcast %cst_30 : f32 to vector<8x128xf32>
    %35 = arith.mulf %34, %31 : vector<8x128xf32>
    %36 = arith.select %33, %31, %35 : vector<8x128xi1>, vector<8x128xf32>
    %c0_31 = arith.constant 0 : index
    %c3 = arith.constant 3 : index
    %c0_32 = arith.constant 0 : index
    %c0_33 = arith.constant 0 : index
    %37 = vector.load %arg3[%c0_31, %c3, %c0_32, %c0_33] : memref<1x4x128x128xf32, #tpu.memory_space<vmem>>, vector<1x1x128x128xf32>
    %38 = vector.shape_cast %37 : vector<1x1x128x128xf32> to vector<128x128xf32>
    %c0_34 = arith.constant 0 : index
    %c3_35 = arith.constant 3 : index
    %c0_36 = arith.constant 0 : index
    %c0_37 = arith.constant 0 : index
    %39 = vector.load %arg4[%c0_34, %c3_35, %c0_36, %c0_37] : memref<1x4x1x128xf32, #tpu.memory_space<vmem>>, vector<1x1x1x128xf32>
    %40 = vector.shape_cast %39 : vector<1x1x1x128xf32> to vector<1x128xf32>
    %cst_38 = arith.constant dense<0.000000e+00> : vector<8x128xf32>
    %41 = tpu.matmul %36, %38, %cst_38 {dimension_numbers = #tpu.dot_dimension_numbers<[1], [0], [0], [1], [0, 0, 1, 1], [], []>} : vector<8x128xf32>, vector<128x128xf32>, vector<8x128xf32> -> vector<8x128xf32>
    %42 = vector.broadcast %40 : vector<1x128xf32> to vector<8x128xf32>
    %43 = arith.addf %41, %42 : vector<8x128xf32>
    %cst_39 = arith.constant 0.000000e+00 : f32
    %44 = vector.broadcast %cst_39 : f32 to vector<8x128xf32>
    %45 = arith.cmpf oge, %43, %44 : vector<8x128xf32>
    %cst_40 = arith.constant 2.000000e-01 : f32
    %46 = vector.broadcast %cst_40 : f32 to vector<8x128xf32>
    %47 = arith.mulf %46, %43 : vector<8x128xf32>
    %48 = arith.select %45, %43, %47 : vector<8x128xi1>, vector<8x128xf32>
    %c0_41 = arith.constant 0 : index
    %c0_42 = arith.constant 0 : index
    %c0_43 = arith.constant 0 : index
    %49 = vector.load %arg5[%c0_41, %c0_42, %c0_43] : memref<1x8x128xf32, #tpu.memory_space<vmem>>, vector<1x8x128xf32>
    %50 = vector.shape_cast %49 : vector<1x8x128xf32> to vector<8x128xf32>
    %51 = vector.shape_cast %48 : vector<8x128xf32> to vector<1x8x128xf32>
    tpu.vector_store %arg5[%c0_41, %c0_42, %c0_43], %51 {strides = array<i32>} : memref<1x8x128xf32, #tpu.memory_space<vmem>>, vector<1x8x128xf32>,
    return
  }
  func.func @transform_0(%arg0: i32, %arg1: i32) -> (i32, i32) {
    %c0_i32 = arith.constant 0 : i32
    %c0_i32_0 = arith.constant 0 : i32
    return %arg1, %c0_i32 : i32, i32
  }
  func.func @transform_1(%arg0: i32, %arg1: i32) -> (i32, i32, i32, i32) {
    %c0_i32 = arith.constant 0 : i32
    %c0_i32_0 = arith.constant 0 : i32
    %c0_i32_1 = arith.constant 0 : i32
    %c0_i32_2 = arith.constant 0 : i32
    return %arg0, %c0_i32, %c0_i32_0, %c0_i32_1 : i32, i32, i32, i32
  }
  func.func @transform_2(%arg0: i32, %arg1: i32) -> (i32, i32, i32, i32) {
    %c0_i32 = arith.constant 0 : i32
    %c0_i32_0 = arith.constant 0 : i32
    %c0_i32_1 = arith.constant 0 : i32
    %c0_i32_2 = arith.constant 0 : i32
    return %arg0, %c0_i32, %c0_i32_0, %c0_i32_1 : i32, i32, i32, i32
  }
  func.func @transform_3(%arg0: i32, %arg1: i32) -> (i32, i32, i32) {
    %c0_i32 = arith.constant 0 : i32
    %c0_i32_0 = arith.constant 0 : i32
    return %arg0, %arg1, %c0_i32 : i32, i32, i32
  }
}

</mosaic_0001>

<bundles_post_ra>
// kernel: mapping_network_cs_forward.1
= control target key start
LH: loop header
LB: loop body
LE: loop exit
PB: predicated region body
PF: predicated region fallthrough
CT: control target
= control target key end

     0   :  { %v772_v0 = vmov 0.0|0.0   ;;  %vm773_vm0 = vmmov 0   ;;  %v774_v4 = vmov 0.0   ;;  %s1045_s1 = inlined_call_operand.vmem [shape: f32[1,4,128,128], index: 1, kind: input, shape index: {}]   ;;  %s1046_s0 = inlined_call_operand.vmem [shape: f32[8,128], index: 0, kind: input, shape index: {}]   ;;  %s1047_s2 = inlined_call_operand.vmem [shape: f32[1,4,1,128], index: 2, kind: input, shape index: {}]   ;;  %s1048_s3 = inlined_call_operand.vmem [shape: f32[1,8,128], index: 3, kind: output, shape index: {}]  }
   0x1   :  { %673 = vmatprep.subr.bf16.mxu0 %v772_v0  ;;  %v15_v1 = vld [vmem:[%s1045_s1] sm:$0xff]  ;;  %v16_v2 = vld [vmem:[%s1045_s1 + $0x8] sm:$0xff]  ;;  %v17_v3 = vld [vmem:[%s1045_s1 + $0x10] sm:$0xff]  ;;  %565 = vmatprep.mubr.msk.f32.mxu0 %vm773_vm0, %v774_v4 }
   0x2   :  { %v674_v5 = vpack.c.bf16 %v16_v2, %v15_v1  ;;  %v18_v6 = vld [vmem:[%s1045_s1 + $0x18] sm:$0xff]  ;;  %697 = vmatprep.subr.bf16.mxu1 %v772_v0  ;;  %600 = vmatprep.mubr.msk.f32.mxu1 %vm773_vm0, %v774_v4  ;;  %v19_v8 = vld [vmem:[%s1045_s1 + $0x20] sm:$0xff]  ;;  %v20_v9 = vld [vmem:[%s1045_s1 + $0x28] sm:$0xff] }
   0x3   :  { %v677_v7 = vpack.c.bf16 %v18_v6, %v17_v3  ;;  %v411_v10 = vld [vmem:[%s1045_s1 + $0x80] sm:$0xff]  ;;  %v412_v11 = vld [vmem:[%s1045_s1 + $0x88] sm:$0xff]  ;;  %v413_v12 = vld [vmem:[%s1045_s1 + $0x90] sm:$0xff]  ;;  %v680_v14 = vpack.c.bf16 %v20_v9, %v19_v8 }
   0x4   :  { %675 = vmatpush3.bf16.msra.mxu0 %v674_v5  ;;  %v414_v13 = vld [vmem:[%s1045_s1 + $0x98] sm:$0xff]  ;;  %v698_v15 = vpack.c.bf16 %v412_v11, %v411_v10  ;;  %v21_v16 = vld [vmem:[%s1045_s1 + $0x30] sm:$0xff]  ;;  %v415_v19 = vld [vmem:[%s1045_s1 + $0xa0] sm:$0xff] }
   0x5   :  { %676 = vmatprep.subr.bf16.mxu0 %v772_v0  ;;  %v22_v17 = vld [vmem:[%s1045_s1 + $0x38] sm:$0xff]  ;;  %v701_v18 = vpack.c.bf16 %v414_v13, %v413_v12  ;;  %v416_v20 = vld [vmem:[%s1045_s1 + $0xa8] sm:$0xff]  ;;  %v23_v22 = vld [vmem:[%s1045_s1 + $0x40] sm:$0xff] }
   0x6   :  { %699 = vmatpush3.bf16.msra.mxu1 %v698_v15  ;;  %v683_v21 = vpack.c.bf16 %v22_v17, %v21_v16  ;;  %v24_v23 = vld [vmem:[%s1045_s1 + $0x48] sm:$0xff]  ;;  %v704_v24 = vpack.c.bf16 %v416_v20, %v415_v19  ;;  %v417_v25 = vld [vmem:[%s1045_s1 + $0xb0] sm:$0xff]  ;;  %v418_v26 = vld [vmem:[%s1045_s1 + $0xb8] sm:$0xff] }
   0x7   :  { %700 = vmatprep.subr.bf16.mxu1 %v772_v0  ;;  %v686_v27 = vpack.c.bf16 %v24_v23, %v23_v22  ;;  %v25_v28 = vld [vmem:[%s1045_s1 + $0x50] sm:$0xff]  ;;  %v26_v29 = vld [vmem:[%s1045_s1 + $0x58] sm:$0xff]  ;;  %v707_v30 = vpack.c.bf16 %v418_v26, %v417_v25  ;;  %v419_v31 = vld [vmem:[%s1045_s1 + $0xc0] sm:$0xff] }
   0x8   :  { %678 = vmatpush3.bf16.msra.mxu0 %v677_v7  ;;  %v420_v32 = vld [vmem:[%s1045_s1 + $0xc8] sm:$0xff]  ;;  %v689_v33 = vpack.c.bf16 %v26_v29, %v25_v28  ;;  %v27_v34 = vld [vmem:[%s1045_s1 + $0x60] sm:$0xff]  ;;  %v421_v37 = vld [vmem:[%s1045_s1 + $0xd0] sm:$0xff] }
   0x9   :  { %679 = vmatprep.subr.bf16.mxu0 %v772_v0  ;;  %v28_v35 = vld [vmem:[%s1045_s1 + $0x68] sm:$0xff]  ;;  %v710_v36 = vpack.c.bf16 %v420_v32, %v419_v31  ;;  %v422_v38 = vld [vmem:[%s1045_s1 + $0xd8] sm:$0xff]  ;;  %v29_v40 = vld [vmem:[%s1045_s1 + $0x70] sm:$0xff] }
   0xa   :  { %702 = vmatpush3.bf16.msra.mxu1 %v701_v18  ;;  %v692_v39 = vpack.c.bf16 %v28_v35, %v27_v34  ;;  %v30_v41 = vld [vmem:[%s1045_s1 + $0x78] sm:$0xff]  ;;  %v713_v42 = vpack.c.bf16 %v422_v38, %v421_v37  ;;  %v423_v43 = vld [vmem:[%s1045_s1 + $0xe0] sm:$0xff]  ;;  %v424_v44 = vld [vmem:[%s1045_s1 + $0xe8] sm:$0xff] }
   0xb   :  { %703 = vmatprep.subr.bf16.mxu1 %v772_v0  ;;  %v695_v45 = vpack.c.bf16 %v30_v41, %v29_v40  ;;  %v716_v46 = vpack.c.bf16 %v424_v44, %v423_v43  ;;  %v14_v47 = vld [vmem:[%s1046_s0] sm:$0xff]  ;;  %v425_v48 = vld [vmem:[%s1045_s1 + $0xf0] sm:$0xff]  ;;  %v426_v49 = vld [vmem:[%s1045_s1 + $0xf8] sm:$0xff] }
   0xc   :  { %681 = vmatpush3.bf16.msra.mxu0 %v680_v14  ;;  %v719_v50 = vpack.c.bf16 %v426_v49, %v425_v48  ;;  %v429_v51 = vld [vmem:[%s1045_s1 + $0x100] sm:$0xff]  ;;  %v430_v52 = vld [vmem:[%s1045_s1 + $0x108] sm:$0xff]  ;;  %v431_v53 = vld [vmem:[%s1045_s1 + $0x110] sm:$0xff] }
   0xd   :  { %682 = vmatprep.subr.bf16.mxu0 %v772_v0  ;;  %v722_v54 = vpack.c.bf16 %v430_v52, %v429_v51  ;;  %v432_v55 = vld [vmem:[%s1045_s1 + $0x118] sm:$0xff]  ;;  %v433_v57 = vld [vmem:[%s1045_s1 + $0x120] sm:$0xff]  ;;  %v434_v58 = vld [vmem:[%s1045_s1 + $0x128] sm:$0xff] }
   0xe   :  { %705 = vmatpush3.bf16.msra.mxu1 %v704_v24  ;;  %v725_v56 = vpack.c.bf16 %v432_v55, %v431_v53  ;;  %v728_v59 = vpack.c.bf16 %v434_v58, %v433_v57  ;;  %v435_v60 = vld [vmem:[%s1045_s1 + $0x130] sm:$0xff]  ;;  %v436_v61 = vld [vmem:[%s1045_s1 + $0x138] sm:$0xff]  ;;  %v437_v63 = vld [vmem:[%s1045_s1 + $0x140] sm:$0xff] }
   0xf   :  { %706 = vmatprep.subr.bf16.mxu1 %v772_v0  ;;  %v731_v62 = vpack.c.bf16 %v436_v61, %v435_v60  ;;  %v438_v1 = vld [vmem:[%s1045_s1 + $0x148] sm:$0xff]  ;;  %v439_v3 = vld [vmem:[%s1045_s1 + $0x150] sm:$0xff]  ;;  %v440_v5 = vld [vmem:[%s1045_s1 + $0x158] sm:$0xff] }
  0x10   :  { %684 = vmatpush3.bf16.msra.mxu0 %v683_v21  ;;  %v734_v2 = vpack.c.bf16 %v438_v1, %v437_v63  ;;  %v737_v6 = vpack.c.bf16 %v440_v5, %v439_v3  ;;  %v441_v7 = vld [vmem:[%s1045_s1 + $0x160] sm:$0xff]  ;;  %v442_v8 = vld [vmem:[%s1045_s1 + $0x168] sm:$0xff]  ;;  %v443_v16 = vld [vmem:[%s1045_s1 + $0x170] sm:$0xff] }
  0x11   :  { %685 = vmatprep.subr.bf16.mxu0 %v772_v0  ;;  %v740_v9 = vpack.c.bf16 %v442_v8, %v441_v7  ;;  %v410_v10 = vld [vmem:[%s1047_s2] ss:$0 sm:$0xff]  ;;  %v444_v17 = vld [vmem:[%s1045_s1 + $0x178] sm:$0xff]  ;;  %v448_v20 = vld [vmem:[%s1045_s1 + $0x188] sm:$0xff] }
  0x12   :  { %708 = vmatpush3.bf16.msra.mxu1 %v707_v30  ;;  %v743_v18 = vpack.c.bf16 %v444_v17, %v443_v16  ;;  %v447_v19 = vld [vmem:[%s1045_s1 + $0x180] sm:$0xff]  ;;  %v450_v22 = vld [vmem:[%s1045_s1 + $0x198] sm:$0xff]  ;;  %v452_v25 = vld [vmem:[%s1045_s1 + $0x1a8] sm:$0xff] }
  0x13   :  { %709 = vmatprep.subr.bf16.mxu1 %v772_v0  ;;  %v746_v21 = vpack.c.bf16 %v448_v20, %v447_v19  ;;  %v451_v24 = vld [vmem:[%s1045_s1 + $0x1a0] sm:$0xff]  ;;  %v454_v28 = vld [vmem:[%s1045_s1 + $0x1b8] sm:$0xff]  ;;  %v456_v31 = vld [vmem:[%s1045_s1 + $0x1c8] sm:$0xff] }
  0x14   :  { %687 = vmatpush3.bf16.msra.mxu0 %v686_v27  ;;  %v752_v26 = vpack.c.bf16 %v452_v25, %v451_v24  ;;  %v453_v27 = vld [vmem:[%s1045_s1 + $0x1b0] sm:$0xff]  ;;  %v455_v30 = vld [vmem:[%s1045_s1 + $0x1c0] sm:$0xff]  ;;  %v458_v34 = vld [vmem:[%s1045_s1 + $0x1d8] sm:$0xff] }
  0x15   :  { %688 = vmatprep.subr.bf16.mxu0 %v772_v0  ;;  %v755_v29 = vpack.c.bf16 %v454_v28, %v453_v27  ;;  %v758_v32 = vpack.c.bf16 %v456_v31, %v455_v30  ;;  %v460_v37 = vld [vmem:[%s1045_s1 + $0x1e8] sm:$0xff]  ;;  %v464_v53 = vld [vmem:[%s1047_s2 + $0x3] ss:$0 sm:$0xff] }
  0x16   :  { %711 = vmatpush3.bf16.msra.mxu1 %v710_v36  ;;  %v459_v36 = vld [vmem:[%s1045_s1 + $0x1e0] sm:$0xff] }
  0x17   :  { %712 = vmatprep.subr.bf16.mxu1 %v772_v0  ;;  %v764_v38 = vpack.c.bf16 %v460_v37, %v459_v36 }
  0x18   :  { %690 = vmatpush3.bf16.msra.mxu0 %v689_v33  ;;  %v457_v33 = vld [vmem:[%s1045_s1 + $0x1d0] sm:$0xff] }
  0x19   :  { %691 = vmatprep.subr.bf16.mxu0 %v772_v0  ;;  %v761_v35 = vpack.c.bf16 %v458_v34, %v457_v33 }
  0x1a   :  { %714 = vmatpush3.bf16.msra.mxu1 %v713_v42 }
  0x1b   :  { %715 = vmatprep.subr.bf16.mxu1 %v772_v0 }
  0x1c   :  { %693 = vmatpush3.bf16.msra.mxu0 %v692_v39  ;;  %v428_v39 = vld [vmem:[%s1047_s2 + $0x1] ss:$0 sm:$0xff] }
  0x1d   :  { %694 = vmatprep.subr.bf16.mxu0 %v772_v0 }
  0x1e   :  { %717 = vmatpush3.bf16.msra.mxu1 %v716_v46  ;;  %v462_v46 = vld [vmem:[%s1045_s1 + $0x1f8] sm:$0xff] }
  0x1f   :  { %718 = vmatprep.subr.bf16.mxu1 %v772_v0 }
  0x20   :  { %696 = vmatpush3.bf16.msra.mxu0 %v695_v45  ;;  %v461_v45 = vld [vmem:[%s1045_s1 + $0x1f0] sm:$0xff] }
  0x21   :  { %721 = vmatprep.subr.bf16.mxu0 %v772_v0 }
  0x22   :  { %720 = vmatpush3.bf16.msra.mxu1 %v719_v50 }
  0x23   :  { %566 = vmatmul.mubr.f32.vlgmr.msra.gmra.mrb[0].mxu0 %v14_v47  ;;  %745 = vmatprep.subr.bf16.mxu1 %v772_v0  ;;  %v446_v47 = vld [vmem:[%s1047_s2 + $0x2] ss:$0 sm:$0xff] }
  0x24   :  { %635 = vmatprep.mubr.msk.f32.mxu0 %vm773_vm0, %v774_v4  ;;  %723 = vmatpush3.bf16.msra.mxu0 %v722_v54 }
  0x25   :  { %724 = vmatprep.subr.bf16.mxu0 %v772_v0 }
  0x28   :  { %726 = vmatpush3.bf16.msra.mxu0 %v725_v56 }
  0x29   :  { %727 = vmatprep.subr.bf16.mxu0 %v772_v0 }
  0x2c   :  { %729 = vmatpush3.bf16.msra.mxu0 %v728_v59 }
  0x2d   :  { %730 = vmatprep.subr.bf16.mxu0 %v772_v0 }
  0x30   :  { %732 = vmatpush3.bf16.msra.mxu0 %v731_v62 }
  0x31   :  { %733 = vmatprep.subr.bf16.mxu0 %v772_v0 }
  0x34   :  { %735 = vmatpush3.bf16.msra.mxu0 %v734_v2 }
  0x35   :  { %736 = vmatprep.subr.bf16.mxu0 %v772_v0 }
  0x38   :  { %738 = vmatpush3.bf16.msra.mxu0 %v737_v6 }
  0x39   :  { %739 = vmatprep.subr.bf16.mxu0 %v772_v0 }
  0x3c   :  { %741 = vmatpush3.bf16.msra.mxu0 %v740_v9 }
  0x3d   :  { %742 = vmatprep.subr.bf16.mxu0 %v772_v0 }
  0x40   :  { %744 = vmatpush3.bf16.msra.mxu0 %v743_v18 }
  0xf6   :  { %v104_v11 = vpop.f32.mrb[0].mxu0 }
  0xf7   :  { %v105_v12 = vadd.f32 %v410_v10, %v104_v11  ;;  %v567_v13 = vpop.f32.mrb[1].mxu0 }
  0xf9   :  { %v109_v14 = vmul.f32 0.2, %v105_v12  ;;  %vm108_vm1 = vcmp.ge.f32.partialorder %v105_v12, 0.0 }
  0xfb   :  { %v110_v15 = vsel %vm108_vm1, %v105_v12, %v109_v14 }
  0xfc   :  { %601 = vmatmul.mubr.f32.vlgmr.msra.gmra.mrb[0].mxu1 %v110_v15 }
  0xfd   :  { %670 = vmatprep.mubr.msk.f32.mxu1 %vm773_vm0, %v774_v4  ;;  %v449_v4 = vld [vmem:[%s1045_s1 + $0x190] sm:$0xff]  ;;  %747 = vmatpush3.bf16.msra.mxu1 %v746_v21 }
  0xfe   :  { %v749_v23 = vpack.c.bf16 %v450_v22, %v449_v4  ;;  %748 = vmatprep.subr.bf16.mxu1 %v772_v0 }
 0x101   :  { %750 = vmatpush3.bf16.msra.mxu1 %v749_v23 }
 0x102   :  { %751 = vmatprep.subr.bf16.mxu1 %v772_v0 }
 0x105   :  { %753 = vmatpush3.bf16.msra.mxu1 %v752_v26 }
 0x106   :  { %754 = vmatprep.subr.bf16.mxu1 %v772_v0 }
 0x109   :  { %756 = vmatpush3.bf16.msra.mxu1 %v755_v29 }
 0x10a   :  { %757 = vmatprep.subr.bf16.mxu1 %v772_v0 }
 0x10d   :  { %759 = vmatpush3.bf16.msra.mxu1 %v758_v32 }
 0x10e   :  { %760 = vmatprep.subr.bf16.mxu1 %v772_v0 }
 0x111   :  { %762 = vmatpush3.bf16.msra.mxu1 %v761_v35 }
 0x112   :  { %763 = vmatprep.subr.bf16.mxu1 %v772_v0 }
 0x115   :  { %765 = vmatpush3.bf16.msra.mxu1 %v764_v38 }
 0x116   :  { %766 = vmatprep.subr.bf16.mxu1 %v772_v0  ;;  %v767_v0 = vpack.c.bf16 %v462_v46, %v461_v45 }
 0x119   :  { %768 = vmatpush3.bf16.msra.mxu1 %v767_v0 }
 0x1cf   :  { %v202_v40 = vpop.f32.mrb[0].mxu1 }
 0x1d0   :  { %v203_v41 = vadd.f32 %v428_v39, %v202_v40  ;;  %v602_v42 = vpop.f32.mrb[1].mxu1 }
 0x1d2   :  { %vm206_vm2 = vcmp.ge.f32.partialorder %v203_v41, 0.0  ;;  %v207_v43 = vmul.f32 0.2, %v203_v41 }
 0x1d4   :  { %v208_v44 = vsel %vm206_vm2, %v203_v41, %v207_v43 }
 0x1d5   :  { %636 = vmatmul.mubr.f32.vlgmr.msra.gmra.mrb[2].mxu0 %v208_v44 }
 0x2a8   :  { %v300_v48 = vpop.f32.mrb[2].mxu0 }
 0x2a9   :  { %v301_v49 = vadd.f32 %v446_v47, %v300_v48  ;;  %v637_v50 = vpop.f32.mrb[3].mxu0 }
 0x2ab   :  { %vm304_vm3 = vcmp.ge.f32.partialorder %v301_v49, 0.0  ;;  %v305_v51 = vmul.f32 0.2, %v301_v49 }
 0x2ad   :  { %v306_v52 = vsel %vm304_vm3, %v301_v49, %v305_v51 }
 0x2ae   :  { %671 = vmatmul.mubr.f32.vlgmr.msra.gmra.mrb[2].mxu1 %v306_v52 }
 0x381   :  { %v398_v54 = vpop.f32.mrb[2].mxu1 }
 0x382   :  { %v399_v55 = vadd.f32 %v464_v53, %v398_v54  ;;  %v672_v56 = vpop.f32.mrb[3].mxu1 }
 0x384   :  { %vm402_vm4 = vcmp.ge.f32.partialorder %v399_v55, 0.0  ;;  %v403_v57 = vmul.f32 0.2, %v399_v55 }
 0x386   :  { %v404_v58 = vsel %vm402_vm4, %v399_v55, %v403_v57 }
 0x387   :  { %405 = vst [vmem:[%s1048_s3] sm:$0xff] %v404_v58 }

</bundles_post_ra>
